<compile_context>
chip_gen: v7x
topology: tpu7x:2x2x1
jax: 0.10.0
libtpu: 0.0.40
codegen_flags: <defaults>
</compile_context>

<pallas_src>
import math

import jax
import jax.numpy as jnp
from jax import lax
from jax.experimental import pallas as pl
from jax.experimental.pallas import tpu as pltpu


_SQRT_HALF = 0.7071067811865476


def _gelu_exact(x):
    # matches torch.nn.functional.gelu default (erf-based)
    return 0.5 * x * (1.0 + lax.erf(x * _SQRT_HALF))


def _round_up(x, m):
    return ((x + m - 1) // m) * m


def ffn_p_kernel(x_ref, p_ref, w_in_ref, b_in_ref, w_p_ref, b_p_ref,
                 w_out_ref, b_out_ref, o_ref):
    # x_ref / p_ref / o_ref: (1, dim, ts)   -- lane axis = spatial tile
    # w_in / w_p : (hidden, dim),  w_out : (dim, hidden)
    # b_in / b_p : (hidden, 1),    b_out : (dim, 1)
    x = x_ref[0]                      # (dim, ts), native dtype (f32 or bf16)
    p = p_ref[0]

    # project_in / con1x1 : (hidden, dim) @ (dim, ts) -> (hidden, ts), f32 acc
    h_x = jnp.dot(w_in_ref[...], x, preferred_element_type=jnp.float32)
    h_x = h_x + b_in_ref[...].astype(jnp.float32)
    h_p = jnp.dot(w_p_ref[...], p, preferred_element_type=jnp.float32)
    h_p = h_p + b_p_ref[...].astype(jnp.float32)

    # gelu gate in f32 (exact erf gelu == torch F.gelu default)
    h = _gelu_exact(h_x) * h_p

    # project_out : (dim, hidden) @ (hidden, ts) -> (dim, ts)
    out = jnp.dot(w_out_ref[...], h.astype(w_out_ref.dtype),
                  preferred_element_type=jnp.float32)
    out = out + b_out_ref[...].astype(jnp.float32)
    o_ref[0] = out.astype(o_ref.dtype)


def _footprint_bytes(ts, dim, hidden, abytes, wbytes, single_buffer_weights):
    """Rough VMEM footprint for one pipelined grid step."""
    act = 3 * 2 * dim * ts * abytes                      # x, p, out tiles, double-buffered
    wts = 3 * hidden * dim * wbytes                      # w_in, w_p, w_out
    wts *= 1 if single_buffer_weights else 2
    bias = (2 * hidden + dim) * wbytes * 2
    interm = (4 * hidden + dim) * ts * 4                 # f32 temporaries
    return act + wts + bias + interm


# TODO(synk): for very large dim/hidden where the three weight matrices no
# longer fit VMEM, add a hidden-axis grid dimension with an f32 VMEM scratch
# accumulator (pl.when init/finalize) instead of full-weight residency.
def _ffn_p_pallas(x3, p3, params, *, ts, single_buffer_weights):
    """x3, p3: (N, dim, S) with S a multiple of ts."""
    N, dim, S = x3.shape
    hidden = params["w_in"].shape[0]
    grid = (N, S // ts)

    act_spec = pl.BlockSpec((1, dim, ts), lambda n, s: (n, 0, s))

    def weight_spec(shape):
        if single_buffer_weights:
            # constant index_map -> fetched once, resident across the grid;
            # single buffer halves weight VMEM vs. default double-buffering.
            return pl.BlockSpec(shape, lambda n, s: (0, 0),
                                pipeline_mode=pl.Buffered(1))
        return pl.BlockSpec(shape, lambda n, s: (0, 0))

    needed = _footprint_bytes(ts, dim, hidden, x3.dtype.itemsize,
                              params["w_in"].dtype.itemsize,
                              single_buffer_weights)
    # Leave headroom for v7x's 64 MiB / TC physical VMEM.
    vmem_limit = int(min(max(needed + (8 << 20), 32 << 20), 48 << 20))

    return pl.pallas_call(
        ffn_p_kernel,
        out_shape=jax.ShapeDtypeStruct((N, dim, S), x3.dtype),
        grid_spec=pltpu.PrefetchScalarGridSpec(
            num_scalar_prefetch=0,
            grid=grid,
            in_specs=[
                act_spec,                        # x
                act_spec,                        # p
                weight_spec((hidden, dim)),      # w_in
                weight_spec((hidden, 1)),        # b_in
                weight_spec((hidden, dim)),      # w_p
                weight_spec((hidden, 1)),        # b_p
                weight_spec((dim, hidden)),      # w_out
                weight_spec((dim, 1)),           # b_out
            ],
            out_specs=act_spec,
        ),
        compiler_params=pltpu.CompilerParams(
            dimension_semantics=("parallel", "parallel"),
            vmem_limit_bytes=vmem_limit),
    )(x3, p3,
      params["w_in"], params["b_in"],
      params["w_p"], params["b_p"],
      params["w_out"], params["b_out"])


def feedforward_p(x_nchw, p_nchw, params, *, ts=1024):
    """x_nchw, p_nchw: (N, dim, H, W). Returns (N, dim, H, W)."""
    N, dim, H, W = x_nchw.shape
    hidden = params["w_in"].shape[0]
    S = H * W

    # Free reshape (NCHW is contiguous over H*W): lane axis = spatial.
    x3 = x_nchw.reshape(N, dim, S)
    p3 = p_nchw.reshape(N, dim, S)

    abytes = x3.dtype.itemsize
    wbytes = params["w_in"].dtype.itemsize

    # Spatial tile: multiple of 128, no larger than needed; pad ragged S.
    ts = max(128, min(_round_up(ts, 128), _round_up(S, 128)))
    # Shrink tile until the per-step footprint fits a comfortable VMEM budget.
    vmem_budget = 40 << 20
    while ts > 128 and (ts // 2) % 128 == 0 and \
            _footprint_bytes(ts, dim, hidden, abytes, wbytes, True) > vmem_budget:
        ts //= 2
    S_pad = _round_up(S, ts)
    # Prefer >= 4 total grid steps so v7x's two TensorCores both stay busy.
    while ts > 128 and N * (S_pad // ts) < 4 and (ts // 2) % 128 == 0:
        ts //= 2
        S_pad = _round_up(S, ts)

    if S_pad != S:
        pad = ((0, 0), (0, 0), (0, S_pad - S))
        x3 = jnp.pad(x3, pad)
        p3 = jnp.pad(p3, pad)

    try:
        out3 = _ffn_p_pallas(x3, p3, params, ts=ts, single_buffer_weights=True)
    except Exception:
        # Fallback if this JAX build rejects pipeline_mode=pl.Buffered(1);
        # weights are then default double-buffered (still correct).
        out3 = _ffn_p_pallas(x3, p3, params, ts=ts, single_buffer_weights=False)

    if S_pad != S:
        out3 = out3[:, :, :S]
    return out3.reshape(N, dim, H, W)


def feedforward_p_ref(x_nchw, p_nchw, params):
    """Pure-JAX reference (same math as the PyTorch module)."""
    def conv1x1(t, w, b):  # t: NCHW, w: (Cout, Cin), b: (Cout, 1)
        y = jnp.einsum('oc,nchw->nohw', w, t)
        return y + b.reshape(1, -1, 1, 1)
    hx = conv1x1(x_nchw, params["w_in"], params["b_in"])
    hp = conv1x1(p_nchw, params["w_p"], params["b_p"])
    h = _gelu_exact(hx) * hp
    return conv1x1(h, params["w_out"], params["b_out"])


def init_params(key, dim, ffn_expansion_factor, bias=True, dtype=jnp.float32):
    hidden = int(dim * ffn_expansion_factor)
    ks = jax.random.split(key, 6)
    # Weights stored as (Cout, Cin); 1x1 convs are y = W @ x per pixel column.
    def w(k, cout, cin):
        return jax.random.normal(k, (cout, cin), dtype) * (1.0 / math.sqrt(cin))
    def b(k, cout):
        if bias:
            return jax.random.normal(k, (cout, 1), dtype) * 0.01
        return jnp.zeros((cout, 1), dtype)
    return {
        "w_in":  w(ks[0], hidden, dim), "b_in":  b(ks[1], hidden),
        "w_p":   w(ks[2], hidden, dim), "b_p":   b(ks[3], hidden),
        "w_out": w(ks[4], dim, hidden), "b_out": b(ks[5], dim),
    }
    # NOTE: dwconv weights are not initialized since dwconv is unused in forward.


if __name__ == "__main__":
    key = jax.random.PRNGKey(0)
    k_x, k_p, k_w = jax.random.split(key, 3)

    N, dim, H, W = 2, 4, 16, 16
    ffn_expansion_factor = 2  # hidden = 8

    x = jax.random.normal(k_x, (N, dim, H, W), jnp.float32)
    p = jax.random.normal(k_p, (N, dim, H, W), jnp.float32)
    params = init_params(k_w, dim, ffn_expansion_factor, bias=True)

    out = feedforward_p(x, p, params)
    out = jax.block_until_ready(out)

    ref = feedforward_p_ref(x, p, params)
    assert out.shape == (N, dim, H, W)
    assert jnp.allclose(out, ref, atol=1e-4, rtol=1e-4), "mismatch vs reference"

    print("KERNEL_OK")
</pallas_src>

<mosaic_0001>
module attributes {stable_mosaic.version = 11 : i64} {
  func.func @ffn_p_kernel(%arg0: i32, %arg1: i32, %arg2: memref<1x4x128xf32, #tpu.memory_space<vmem>>, %arg3: memref<1x4x128xf32, #tpu.memory_space<vmem>>, %arg4: memref<8x4xf32, #tpu.memory_space<vmem>>, %arg5: memref<8x1xf32, #tpu.memory_space<vmem>>, %arg6: memref<8x4xf32, #tpu.memory_space<vmem>>, %arg7: memref<8x1xf32, #tpu.memory_space<vmem>>, %arg8: memref<4x8xf32, #tpu.memory_space<vmem>>, %arg9: memref<4x1xf32, #tpu.memory_space<vmem>>, %arg10: memref<1x4x128xf32, #tpu.memory_space<vmem>>) attributes {dimension_semantics = [#tpu.dimension_semantics<parallel>, #tpu.dimension_semantics<parallel>], iteration_bounds = array<i64: 2, 2>, scalar_prefetch = 0 : i64, scratch_operands = 0 : i64, tpu.core_type = #tpu.core_type<tc>, window_params = [{transform_indices = @transform_0, window_bounds = array<i64: 1, 4, 128>}, {transform_indices = @transform_1, window_bounds = array<i64: 1, 4, 128>}, {pipeline_mode = #tpu.pipeline_mode<synchronous>, transform_indices = @transform_2, window_bounds = array<i64: 8, 4>}, {pipeline_mode = #tpu.pipeline_mode<synchronous>, transform_indices = @transform_3, window_bounds = array<i64: 8, 1>}, {pipeline_mode = #tpu.pipeline_mode<synchronous>, transform_indices = @transform_4, window_bounds = array<i64: 8, 4>}, {pipeline_mode = #tpu.pipeline_mode<synchronous>, transform_indices = @transform_5, window_bounds = array<i64: 8, 1>}, {pipeline_mode = #tpu.pipeline_mode<synchronous>, transform_indices = @transform_6, window_bounds = array<i64: 4, 8>}, {pipeline_mode = #tpu.pipeline_mode<synchronous>, transform_indices = @transform_7, window_bounds = array<i64: 4, 1>}, {transform_indices = @transform_8, window_bounds = array<i64: 1, 4, 128>}]} {
    %c0 = arith.constant 0 : index
    %c0_0 = arith.constant 0 : index
    %c0_1 = arith.constant 0 : index
    %0 = vector.load %arg2[%c0, %c0_0, %c0_1] : memref<1x4x128xf32, #tpu.memory_space<vmem>>, vector<1x4x128xf32>
    %1 = vector.shape_cast %0 : vector<1x4x128xf32> to vector<4x128xf32>
    %c0_2 = arith.constant 0 : index
    %c0_3 = arith.constant 0 : index
    %c0_4 = arith.constant 0 : index
    %2 = vector.load %arg3[%c0_2, %c0_3, %c0_4] : memref<1x4x128xf32, #tpu.memory_space<vmem>>, vector<1x4x128xf32>
    %3 = vector.shape_cast %2 : vector<1x4x128xf32> to vector<4x128xf32>
    %c0_5 = arith.constant 0 : index
    %c0_6 = arith.constant 0 : index
    %4 = vector.load %arg4[%c0_5, %c0_6] : memref<8x4xf32, #tpu.memory_space<vmem>>, vector<8x4xf32>
    %cst = arith.constant dense<0.000000e+00> : vector<8x128xf32>
    %5 = tpu.matmul %4, %1, %cst {dimension_numbers = #tpu.dot_dimension_numbers<[1], [0], [0], [1], [0, 0, 1, 1], [], []>} : vector<8x4xf32>, vector<4x128xf32>, vector<8x128xf32> -> vector<8x128xf32>
    %c0_7 = arith.constant 0 : index
    %c0_8 = arith.constant 0 : index
    %6 = vector.load %arg5[%c0_7, %c0_8] : memref<8x1xf32, #tpu.memory_space<vmem>>, vector<8x1xf32>
    %7 = vector.broadcast %6 : vector<8x1xf32> to vector<8x128xf32>
    %8 = arith.addf %5, %7 : vector<8x128xf32>
    %c0_9 = arith.constant 0 : index
    %c0_10 = arith.constant 0 : index
    %9 = vector.load %arg6[%c0_9, %c0_10] : memref<8x4xf32, #tpu.memory_space<vmem>>, vector<8x4xf32>
    %cst_11 = arith.constant dense<0.000000e+00> : vector<8x128xf32>
    %10 = tpu.matmul %9, %3, %cst_11 {dimension_numbers = #tpu.dot_dimension_numbers<[1], [0], [0], [1], [0, 0, 1, 1], [], []>} : vector<8x4xf32>, vector<4x128xf32>, vector<8x128xf32> -> vector<8x128xf32>
    %c0_12 = arith.constant 0 : index
    %c0_13 = arith.constant 0 : index
    %11 = vector.load %arg7[%c0_12, %c0_13] : memref<8x1xf32, #tpu.memory_space<vmem>>, vector<8x1xf32>
    %12 = vector.broadcast %11 : vector<8x1xf32> to vector<8x128xf32>
    %13 = arith.addf %10, %12 : vector<8x128xf32>
    %cst_14 = arith.constant 5.000000e-01 : f32
    %14 = vector.broadcast %cst_14 : f32 to vector<8x128xf32>
    %15 = arith.mulf %14, %8 : vector<8x128xf32>
    %cst_15 = arith.constant 0.707106769 : f32
    %16 = vector.broadcast %cst_15 : f32 to vector<8x128xf32>
    %17 = arith.mulf %8, %16 : vector<8x128xf32>
    %18 = math.erf %17 : vector<8x128xf32>
    %cst_16 = arith.constant 1.000000e+00 : f32
    %19 = vector.broadcast %cst_16 : f32 to vector<8x128xf32>
    %20 = arith.addf %19, %18 : vector<8x128xf32>
    %21 = arith.mulf %15, %20 : vector<8x128xf32>
    %22 = arith.mulf %21, %13 : vector<8x128xf32>
    %c0_17 = arith.constant 0 : index
    %c0_18 = arith.constant 0 : index
    %23 = vector.load %arg8[%c0_17, %c0_18] : memref<4x8xf32, #tpu.memory_space<vmem>>, vector<4x8xf32>
    %cst_19 = arith.constant dense<0.000000e+00> : vector<4x128xf32>
    %24 = tpu.matmul %23, %22, %cst_19 {dimension_numbers = #tpu.dot_dimension_numbers<[1], [0], [0], [1], [0, 0, 1, 1], [], []>} : vector<4x8xf32>, vector<8x128xf32>, vector<4x128xf32> -> vector<4x128xf32>
    %c0_20 = arith.constant 0 : index
    %c0_21 = arith.constant 0 : index
    %25 = vector.load %arg9[%c0_20, %c0_21] : memref<4x1xf32, #tpu.memory_space<vmem>>, vector<4x1xf32>
    %26 = vector.broadcast %25 : vector<4x1xf32> to vector<4x128xf32>
    %27 = arith.addf %24, %26 : vector<4x128xf32>
    %c0_22 = arith.constant 0 : index
    %c0_23 = arith.constant 0 : index
    %c0_24 = arith.constant 0 : index
    %28 = vector.load %arg10[%c0_22, %c0_23, %c0_24] : memref<1x4x128xf32, #tpu.memory_space<vmem>>, vector<1x4x128xf32>
    %29 = vector.shape_cast %28 : vector<1x4x128xf32> to vector<4x128xf32>
    %30 = vector.shape_cast %27 : vector<4x128xf32> to vector<1x4x128xf32>
    tpu.vector_store %arg10[%c0_22, %c0_23, %c0_24], %30 {strides = array<i32>} : memref<1x4x128xf32, #tpu.memory_space<vmem>>, vector<1x4x128xf32>,
    return
  }
  func.func @transform_0(%arg0: i32, %arg1: i32) -> (i32, i32, i32) {
    %c0_i32 = arith.constant 0 : i32
    %c0_i32_0 = arith.constant 0 : i32
    return %arg0, %c0_i32, %arg1 : i32, i32, i32
  }
  func.func @transform_1(%arg0: i32, %arg1: i32) -> (i32, i32, i32) {
    %c0_i32 = arith.constant 0 : i32
    %c0_i32_0 = arith.constant 0 : i32
    return %arg0, %c0_i32, %arg1 : i32, i32, i32
  }
  func.func @transform_2(%arg0: i32, %arg1: i32) -> (i32, i32) {
    %c0_i32 = arith.constant 0 : i32
    %c0_i32_0 = arith.constant 0 : i32
    %c0_i32_1 = arith.constant 0 : i32
    return %c0_i32, %c0_i32_0 : i32, i32
  }
  func.func @transform_3(%arg0: i32, %arg1: i32) -> (i32, i32) {
    %c0_i32 = arith.constant 0 : i32
    %c0_i32_0 = arith.constant 0 : i32
    %c0_i32_1 = arith.constant 0 : i32
    return %c0_i32, %c0_i32_0 : i32, i32
  }
  func.func @transform_4(%arg0: i32, %arg1: i32) -> (i32, i32) {
    %c0_i32 = arith.constant 0 : i32
    %c0_i32_0 = arith.constant 0 : i32
    %c0_i32_1 = arith.constant 0 : i32
    return %c0_i32, %c0_i32_0 : i32, i32
  }
  func.func @transform_5(%arg0: i32, %arg1: i32) -> (i32, i32) {
    %c0_i32 = arith.constant 0 : i32
    %c0_i32_0 = arith.constant 0 : i32
    %c0_i32_1 = arith.constant 0 : i32
    return %c0_i32, %c0_i32_0 : i32, i32
  }
  func.func @transform_6(%arg0: i32, %arg1: i32) -> (i32, i32) {
    %c0_i32 = arith.constant 0 : i32
    %c0_i32_0 = arith.constant 0 : i32
    %c0_i32_1 = arith.constant 0 : i32
    return %c0_i32, %c0_i32_0 : i32, i32
  }
  func.func @transform_7(%arg0: i32, %arg1: i32) -> (i32, i32) {
    %c0_i32 = arith.constant 0 : i32
    %c0_i32_0 = arith.constant 0 : i32
    %c0_i32_1 = arith.constant 0 : i32
    return %c0_i32, %c0_i32_0 : i32, i32
  }
  func.func @transform_8(%arg0: i32, %arg1: i32) -> (i32, i32, i32) {
    %c0_i32 = arith.constant 0 : i32
    %c0_i32_0 = arith.constant 0 : i32
    return %arg0, %c0_i32, %arg1 : i32, i32, i32
  }
}

module attributes {stable_mosaic.version = 11 : i64} {
  func.func @ffn_p_kernel(%arg0: i32, %arg1: i32, %arg2: memref<1x4x128xf32, #tpu.memory_space<vmem>>, %arg3: memref<1x4x128xf32, #tpu.memory_space<vmem>>, %arg4: memref<8x4xf32, #tpu.memory_space<vmem>>, %arg5: memref<8x1xf32, #tpu.memory_space<vmem>>, %arg6: memref<8x4xf32, #tpu.memory_space<vmem>>, %arg7: memref<8x1xf32, #tpu.memory_space<vmem>>, %arg8: memref<4x8xf32, #tpu.memory_space<vmem>>, %arg9: memref<4x1xf32, #tpu.memory_space<vmem>>, %arg10: memref<1x4x128xf32, #tpu.memory_space<vmem>>) attributes {dimension_semantics = [#tpu.dimension_semantics<parallel>, #tpu.dimension_semantics<parallel>], iteration_bounds = array<i64: 2, 2>, scalar_prefetch = 0 : i64, scratch_operands = 0 : i64, tpu.core_type = #tpu.core_type<tc>, window_params = [{transform_indices = @transform_0, window_bounds = array<i64: 1, 4, 128>}, {transform_indices = @transform_1, window_bounds = array<i64: 1, 4, 128>}, {pipeline_mode = #tpu.pipeline_mode<synchronous>, transform_indices = @transform_2, window_bounds = array<i64: 8, 4>}, {pipeline_mode = #tpu.pipeline_mode<synchronous>, transform_indices = @transform_3, window_bounds = array<i64: 8, 1>}, {pipeline_mode = #tpu.pipeline_mode<synchronous>, transform_indices = @transform_4, window_bounds = array<i64: 8, 4>}, {pipeline_mode = #tpu.pipeline_mode<synchronous>, transform_indices = @transform_5, window_bounds = array<i64: 8, 1>}, {pipeline_mode = #tpu.pipeline_mode<synchronous>, transform_indices = @transform_6, window_bounds = array<i64: 4, 8>}, {pipeline_mode = #tpu.pipeline_mode<synchronous>, transform_indices = @transform_7, window_bounds = array<i64: 4, 1>}, {transform_indices = @transform_8, window_bounds = array<i64: 1, 4, 128>}]} {
    %c0 = arith.constant 0 : index
    %c0_0 = arith.constant 0 : index
    %c0_1 = arith.constant 0 : index
    %0 = vector.load %arg2[%c0, %c0_0, %c0_1] : memref<1x4x128xf32, #tpu.memory_space<vmem>>, vector<1x4x128xf32>
    %1 = vector.shape_cast %0 : vector<1x4x128xf32> to vector<4x128xf32>
    %c0_2 = arith.constant 0 : index
    %c0_3 = arith.constant 0 : index
    %c0_4 = arith.constant 0 : index
    %2 = vector.load %arg3[%c0_2, %c0_3, %c0_4] : memref<1x4x128xf32, #tpu.memory_space<vmem>>, vector<1x4x128xf32>
    %3 = vector.shape_cast %2 : vector<1x4x128xf32> to vector<4x128xf32>
    %c0_5 = arith.constant 0 : index
    %c0_6 = arith.constant 0 : index
    %4 = vector.load %arg4[%c0_5, %c0_6] : memref<8x4xf32, #tpu.memory_space<vmem>>, vector<8x4xf32>
    %cst = arith.constant dense<0.000000e+00> : vector<8x128xf32>
    %5 = tpu.matmul %4, %1, %cst {dimension_numbers = #tpu.dot_dimension_numbers<[1], [0], [0], [1], [0, 0, 1, 1], [], []>} : vector<8x4xf32>, vector<4x128xf32>, vector<8x128xf32> -> vector<8x128xf32>
    %c0_7 = arith.constant 0 : index
    %c0_8 = arith.constant 0 : index
    %6 = vector.load %arg5[%c0_7, %c0_8] : memref<8x1xf32, #tpu.memory_space<vmem>>, vector<8x1xf32>
    %7 = vector.broadcast %6 : vector<8x1xf32> to vector<8x128xf32>
    %8 = arith.addf %5, %7 : vector<8x128xf32>
    %c0_9 = arith.constant 0 : index
    %c0_10 = arith.constant 0 : index
    %9 = vector.load %arg6[%c0_9, %c0_10] : memref<8x4xf32, #tpu.memory_space<vmem>>, vector<8x4xf32>
    %cst_11 = arith.constant dense<0.000000e+00> : vector<8x128xf32>
    %10 = tpu.matmul %9, %3, %cst_11 {dimension_numbers = #tpu.dot_dimension_numbers<[1], [0], [0], [1], [0, 0, 1, 1], [], []>} : vector<8x4xf32>, vector<4x128xf32>, vector<8x128xf32> -> vector<8x128xf32>
    %c0_12 = arith.constant 0 : index
    %c0_13 = arith.constant 0 : index
    %11 = vector.load %arg7[%c0_12, %c0_13] : memref<8x1xf32, #tpu.memory_space<vmem>>, vector<8x1xf32>
    %12 = vector.broadcast %11 : vector<8x1xf32> to vector<8x128xf32>
    %13 = arith.addf %10, %12 : vector<8x128xf32>
    %cst_14 = arith.constant 5.000000e-01 : f32
    %14 = vector.broadcast %cst_14 : f32 to vector<8x128xf32>
    %15 = arith.mulf %14, %8 : vector<8x128xf32>
    %cst_15 = arith.constant 0.707106769 : f32
    %16 = vector.broadcast %cst_15 : f32 to vector<8x128xf32>
    %17 = arith.mulf %8, %16 : vector<8x128xf32>
    %18 = math.erf %17 : vector<8x128xf32>
    %cst_16 = arith.constant 1.000000e+00 : f32
    %19 = vector.broadcast %cst_16 : f32 to vector<8x128xf32>
    %20 = arith.addf %19, %18 : vector<8x128xf32>
    %21 = arith.mulf %15, %20 : vector<8x128xf32>
    %22 = arith.mulf %21, %13 : vector<8x128xf32>
    %c0_17 = arith.constant 0 : index
    %c0_18 = arith.constant 0 : index
    %23 = vector.load %arg8[%c0_17, %c0_18] : memref<4x8xf32, #tpu.memory_space<vmem>>, vector<4x8xf32>
    %cst_19 = arith.constant dense<0.000000e+00> : vector<4x128xf32>
    %24 = tpu.matmul %23, %22, %cst_19 {dimension_numbers = #tpu.dot_dimension_numbers<[1], [0], [0], [1], [0, 0, 1, 1], [], []>} : vector<4x8xf32>, vector<8x128xf32>, vector<4x128xf32> -> vector<4x128xf32>
    %c0_20 = arith.constant 0 : index
    %c0_21 = arith.constant 0 : index
    %25 = vector.load %arg9[%c0_20, %c0_21] : memref<4x1xf32, #tpu.memory_space<vmem>>, vector<4x1xf32>
    %26 = vector.broadcast %25 : vector<4x1xf32> to vector<4x128xf32>
    %27 = arith.addf %24, %26 : vector<4x128xf32>
    %c0_22 = arith.constant 0 : index
    %c0_23 = arith.constant 0 : index
    %c0_24 = arith.constant 0 : index
    %28 = vector.load %arg10[%c0_22, %c0_23, %c0_24] : memref<1x4x128xf32, #tpu.memory_space<vmem>>, vector<1x4x128xf32>
    %29 = vector.shape_cast %28 : vector<1x4x128xf32> to vector<4x128xf32>
    %30 = vector.shape_cast %27 : vector<4x128xf32> to vector<1x4x128xf32>
    tpu.vector_store %arg10[%c0_22, %c0_23, %c0_24], %30 {strides = array<i32>} : memref<1x4x128xf32, #tpu.memory_space<vmem>>, vector<1x4x128xf32>,
    return
  }
  func.func @transform_0(%arg0: i32, %arg1: i32) -> (i32, i32, i32) {
    %c0_i32 = arith.constant 0 : i32
    %c0_i32_0 = arith.constant 0 : i32
    return %arg0, %c0_i32, %arg1 : i32, i32, i32
  }
  func.func @transform_1(%arg0: i32, %arg1: i32) -> (i32, i32, i32) {
    %c0_i32 = arith.constant 0 : i32
    %c0_i32_0 = arith.constant 0 : i32
    return %arg0, %c0_i32, %arg1 : i32, i32, i32
  }
  func.func @transform_2(%arg0: i32, %arg1: i32) -> (i32, i32) {
    %c0_i32 = arith.constant 0 : i32
    %c0_i32_0 = arith.constant 0 : i32
    %c0_i32_1 = arith.constant 0 : i32
    return %c0_i32, %c0_i32_0 : i32, i32
  }
  func.func @transform_3(%arg0: i32, %arg1: i32) -> (i32, i32) {
    %c0_i32 = arith.constant 0 : i32
    %c0_i32_0 = arith.constant 0 : i32
    %c0_i32_1 = arith.constant 0 : i32
    return %c0_i32, %c0_i32_0 : i32, i32
  }
  func.func @transform_4(%arg0: i32, %arg1: i32) -> (i32, i32) {
    %c0_i32 = arith.constant 0 : i32
    %c0_i32_0 = arith.constant 0 : i32
    %c0_i32_1 = arith.constant 0 : i32
    return %c0_i32, %c0_i32_0 : i32, i32
  }
  func.func @transform_5(%arg0: i32, %arg1: i32) -> (i32, i32) {
    %c0_i32 = arith.constant 0 : i32
    %c0_i32_0 = arith.constant 0 : i32
    %c0_i32_1 = arith.constant 0 : i32
    return %c0_i32, %c0_i32_0 : i32, i32
  }
  func.func @transform_6(%arg0: i32, %arg1: i32) -> (i32, i32) {
    %c0_i32 = arith.constant 0 : i32
    %c0_i32_0 = arith.constant 0 : i32
    %c0_i32_1 = arith.constant 0 : i32
    return %c0_i32, %c0_i32_0 : i32, i32
  }
  func.func @transform_7(%arg0: i32, %arg1: i32) -> (i32, i32) {
    %c0_i32 = arith.constant 0 : i32
    %c0_i32_0 = arith.constant 0 : i32
    %c0_i32_1 = arith.constant 0 : i32
    return %c0_i32, %c0_i32_0 : i32, i32
  }
  func.func @transform_8(%arg0: i32, %arg1: i32) -> (i32, i32, i32) {
    %c0_i32 = arith.constant 0 : i32
    %c0_i32_0 = arith.constant 0 : i32
    return %arg0, %c0_i32, %arg1 : i32, i32, i32
  }
}

</mosaic_0001>

<bundles_post_ra>
// kernel: tpu_custom_call.1
= control target key start
LH: loop header
LB: loop body
LE: loop exit
PB: predicated region body
PF: predicated region fallthrough
CT: control target
= control target key end

     0   :  { %s1155_s0 = inlined_call_operand.vmem [shape: f32[2,4,256], index: 0, kind: input, shape index: {}]   ;;  %s1156_s1 = inlined_call_operand.vmem [shape: f32[2,4,256], index: 1, kind: input, shape index: {}]   ;;  %s1157_s2 = inlined_call_operand.vmem [shape: f32[8,4], index: 2, kind: input, shape index: {}]   ;;  %s1158_s3 = inlined_call_operand.vmem [shape: f32[8,1], index: 3, kind: input, shape index: {}]   ;;  %s1159_s4 = inlined_call_operand.vmem [shape: f32[8,4], index: 4, kind: input, shape index: {}]   ;;  %s1160_s5 = inlined_call_operand.vmem [shape: f32[8,1], index: 5, kind: input, shape index: {}]   ;;  %s1161_s6 = inlined_call_operand.vmem [shape: f32[4,8], index: 6, kind: input, shape index: {}]   ;;  %s1162_s7 = inlined_call_operand.vmem [shape: f32[4,1], index: 7, kind: input, shape index: {}]   ;;  %s1163_s8 = inlined_call_operand.hbm [shape: f32[2,4,256], index: 8, kind: output, shape index: {}]  }
   0x1   :  { %1168 = sst [smem:[#allocation10_spill]] %s1158_s3 }
   0x2   :  { %13 = vsyncpa [#allocation3], 0 }
   0x3   :  { %15 = vsyncpa [#allocation3 + $0x1], 0  ;;  %s994_s27 = smov 0   ;;  %s996_s28 = smov 0  }
   0x4   :  { %s998_s29 = smov 0   ;;  %s1000_s30 = smov 0  }
   0x5   :  { %s1002_s9 = smov 0   ;;  %s1004_s10 = smov 0  }
   0x6   :  { %s1006_s11 = smov 0   ;;  %s1008_s12 = smov 0  }
   0x7 LB: > { %1169 = sst [smem:[#allocation5_spill]] %s935_s10  ;;  %s730_s13 = sadd.s32 4294967295, %s943_s12   ;;  %s943_s12 = sphi %s1008_s12, %s21_s12   ;;  %s939_s11 = sphi %s1006_s11, %s1181_s11   ;;  %s935_s10 = sphi %s1004_s10, %s1180_s10   ;;  %s931_s9 = sphi %s1002_s9, %s1179_s9   ;;  %s927_s30 = sphi %s1000_s30, %s1178_s30   ;;  %s923_s29 = sphi %s998_s29, %s1184_s29   ;;  %s919_s28 = sphi %s996_s28, %s1183_s28   ;;  %s915_s27 = sphi %s994_s27, %s1182_s27  }
   0x8   : > { %1170 = sst [smem:[#allocation6_spill]] %s939_s11  ;;  %s731_s14 = sadd.s32 4294967294, %s943_s12  }
   0x9   : > { %s30_s15 = sadd.s32 1, %s935_s10  ;;  %s33_s16 = sadd.s32 1, %s939_s11 }
   0xa   : > { %p31_p0 = scmp.ge.s32.totalorder %s30_s15, 2  ;;  %p234_p1 = scmp.ne.s32.totalorder %s923_s29, %s919_s28 }
   0xb   : > { %p235_p2 = scmp.eq.s32.totalorder %s730_s13, 3  ;;  %p240_p5 = scmp.ne.s32.totalorder %s919_s28, %s915_s27 }
   0xc   : > { %s1186_s15 = smov (%p31_p0, %s30_s15), 0  ;;  %s1188_s16 = smov (!%p31_p0, %s33_s16), %s939_s11 }
   0xd   : > { %1171 = sst [smem:[#allocation7_spill]] %s1186_s15  ;;  %s220_s17 = ssub.s32 %s935_s10, %s1186_s15 }
   0xe   : > { %p1045_p3 = por %p235_p2, %p234_p1  ;;  %p35_p4 = scmp.ge.s32.totalorder %s1188_s16, 2 }
   0xf   : > { %p241_p6 = scmp.eq.s32.totalorder %s731_s14, 3  ;;  %p734_p7 = scmp.ge.s32.totalorder %s943_s12, 1 }
  0x10   : > { %s1190_s16 = smov (%p35_p4, %s1188_s16), 0  ;;  %p299_p9 = scmp.lt.s32.totalorder %s943_s12, 5 }
  0x11   : > { %1173 = sst [smem:[#allocation8_spill]] %s1190_s16  ;;  %p1054_p8 = por %p241_p6, %p240_p5 }
  0x12   : > { %s219_s20 = ssub.s32 %s939_s11, %s1190_s16  ;;  %s224_s21 = sadd.s32 1, %s923_s29 }
  0x13   : > { %s221_s22 = sor.u32 %s220_s17, %s219_s20  ;;  %p300_p10 = pnand %p734_p7, %p299_p9 }
  0x14   : > { %p222_p11 = scmp.eq.s32.totalorder %s221_s22, 0  ;;  %p344_p12 = scmp.lt.s32.totalorder (!%p300_p10), %s931_s9, 1  ;;  %v945_v0 = vmov (!%p300_p10), 0.0   ;;  %vm946_vm0 = vmmov (!%p300_p10), 0   ;;  %v947_v2 = vmov (!%p300_p10), 0   ;;  %v448_v3 = vld [vmem:[%s1160_s5] sm:$0xff] (!%p300_p10) }
  0x15   : > { %303 = sbr.rel (%p300_p10) target bundleno = 498 (0x1f2), region = 52  ;;  %p346_p13 = scmp.lt.s32.totalorder (!%p300_p10), %s927_s30, 1  ;;  %756 = vmatprep.subr.mxu0 (!%p300_p10), %v945_v0  ;;  %761 = vmatprep.subr.mxu1 (!%p300_p10), %v945_v0  ;;  %vm373_vm1 = vcmask (!%p300_p10), 1043456   ;;  %v362_v4 = vld [vmem:[%s1157_s2] sm:$0xff] (!%p300_p10)  ;;  %vm369_vm2 = vcmask (!%p300_p10), 31744   ;;  %vm543_vm3 = vcmask (!%p300_p10), 64512  }
  0x16   : > { %s1063_s23 = scalar_select %p222_p11, %s923_s29, %s224_s21  }
  0x17   : > { %s1176_s3 = sld [smem:[#allocation10_spill]] (!%p300_p10)  ;;  %758 = vmatprep.mubr.msk.f32.mxu0 (!%p300_p10), %vm946_vm0, %v945_v0  ;;  %763 = vmatprep.mubr.msk.f32.mxu1 (!%p300_p10), %vm946_vm0, %v945_v0  ;;  %v447_v5 = vld [vmem:[%s1159_s4] sm:$0xff] (!%p300_p10) }
  0x18   : > { %1175 = sst [smem:[#allocation9_spill]] %s1063_s23  ;;  %845 = vset.pattern.permute.xlu0 (!%p300_p10), %v947_v2  ;;  %846 = vset.pattern.permute.xlu1 (!%p300_p10), %v947_v2  ;;  %v537_v8 = vld [vmem:[%s1162_s7] sm:$0xf] (!%p300_p10) }
  0x19   : > { %540 = vperm.xlu1 (!%p300_p10), %846, %v537_v8   ;;  %v536_v23 = vld [vmem:[%s1161_s6] sm:$0xf] (!%p300_p10) }
  0x1c   : > { %s345_s26 = scalar_select %p344_p12, %s931_s9, 1 }
  0x1d   : > { %v363_v1 = vld [vmem:[%s1176_s3] sm:$0xff]  ;;  %s347_s13 = scalar_select %p346_p13, %s927_s30, 1 }
  0x1e   : > { %s736_s14 = sshll.u32 %s345_s26, 1  ;;  %366 = vperm.xlu0 %845, %v363_v1  }
  0x1f   : > { %s349_s17 = sadd.s32 %s736_s14, %s347_s13  ;;  %s746_s14 = sshll.u32 %s931_s9, 1 }
  0x20   : > { %s737_s22 = sshll.u32 %s349_s17, 2  ;;  %s630_s17 = sadd.s32 %s927_s30, %s746_s14 }
  0x21   : > { %s351_s3 = scalar_lea.vmem %s1155_s0, %s737_s22  ;;  %s359_s11 = scalar_lea.vmem %s1156_s1, %s737_s22 }
  0x22   : > { %v360_v6 = vld [vmem:[%s351_s3] sm:$0xf]  ;;  %451 = vperm.xlu0 %845, %v448_v3   ;;  %s747_s20 = sshll.u32 %s630_s17, 6  ;;  %s948_s13 = smov [#allocation2]  }
  0x23   : > { %v361_v7 = vld [vmem:[%s359_s11] sm:$0xf]  ;;  %757 = vmatpush3.msk.msra.mxu0 %vm373_vm1, %v360_v6  ;;  %s341_s11 = sand.u32 1, %s919_s28   ;;  %s1102_s26 = scalar_lea.hbm %s1163_s8, %s747_s20 }
  0x24   : > { %762 = vmatpush3.msk.msra.mxu1 %vm373_vm1, %v361_v7  ;;  %759 = vmatmul.mubr.msk.f32.vlgmr.msra.gmra.mrb[0].mxu0 %vm369_vm2, %v362_v4  ;;  %s735_s23 = sshll.u32 %s341_s11, 2  ;;  %s619_s9 = scalar_lea.sflag [#allocation3], %s341_s11 }
  0x25   : > { %764 = vmatmul.mubr.msk.f32.vlgmr.msra.gmra.mrb[0].mxu1 %vm369_vm2, %v447_v5  ;;  %766 = vmatprep.subr.mxu0 %v945_v0  ;;  %s343_s21 = scalar_lea.vmem [#allocation2], %s735_s23  ;;  %s853_s15 = sshll.u32 %s948_s13, 4  ;;  %s854_s15 = int_to_ptr.vmem [resolvable:$false] %s853_s15 }
  0x26   : > { %768 = vmatprep.mubr.msk.f32.mxu0 %vm946_vm0, %v945_v0  ;;  %s634_s22 = sshll.u32 %s343_s21, 4  ;;  %s855_s16 = scalar_lea.vmem %s854_s15, 128  ;;  %s1104_s22 = int_to_ptr.vmem [resolvable:$true] %s634_s22 }
  0x27   : > { %s849_s30 = scalar_lea.vmem %s1104_s22, 64  ;;  %p856_p4 = scmp.lt.s32.totalorder %s1104_s22, %s854_s15 }
  0x28   : > { %p850_p0 = scmp.ne.s32.totalorder %s1104_s22, %s849_s30  ;;  %p857_p5 = scmp.lt.s32.totalorder %s855_s16, %s849_s30 }
  0x2a   : > { %p851_p1 = pnand %p850_p0, %p1045_p3  ;;  %p858_p6 = por %p857_p5, %p856_p4 }
  0x2c   : > { %p852_p2 = pneg %p851_p1 }
  0x2e   : > { %p859_p7 = pnand %p858_p6, %p852_p2 }
  0x98   : > { %v541_v24 = vpop.permute.xlu1 %540 }
  0x9d   : > { %v367_v9 = vpop.permute.xlu0 %366 }
  0xa1   : > { %v452_v17 = vpop.permute.xlu0 %451 }
  0xf7   : > { %v443_v10 = vpop.f32.mrb[0].mxu0 }
  0xf8   : > { %v526_v11 = vpop.f32.mrb[0].mxu1  ;;  %v444_v12 = vadd.f32 %v443_v10, %v367_v9  ;;  %v760_v13 = vpop.f32.mrb[1].mxu0 }
  0xf9   : > { %v765_v14 = vpop.f32.mrb[1].mxu1  ;;  %v527_v20 = vadd.f32 %v526_v11, %v452_v17 }
  0xfa   : > { %v531_v15 = vmul.f32 0.70710677, %v444_v12  ;;  %v530_v18 = vmul.f32 0.5, %v444_v12 }
  0xfc   : > { %847 = verf.f32 %v531_v15 }
 0x106   : > { %v848_v16 = vpop.eup %847 }
 0x107   : > { %v533_v19 = vadd.f32 1.0, %v848_v16 }
 0x109   : > { %v534_v21 = vmul.f32 %v533_v19, %v530_v18 }
 0x10b   : > { %v535_v22 = vmul.f32 %v534_v21, %v527_v20 }
 0x10d   : > { %767 = vmatpush3.msra.mxu0 %v535_v22 }
 0x10e   : > { %769 = vmatmul.mubr.msk.f32.vlgmr.msra.gmra.mrb[2].mxu0 %vm543_vm3, %v536_v23 }
 0x1e1   : > { %v613_v25 = vpop.f32.mrb[2].mxu0 }
 0x1e2   : > { %v614_v26 = vadd.f32 %v613_v25, %v541_v24  ;;  %v770_v27 = vpop.f32.mrb[3].mxu0 }
 0x1e4   : > { %617 = vst [vmem:[%s343_s21] sm:$0xf] %v614_v26 }
 0x1e5   : > { %862 = shalt.err (!%p859_p7)
}
 0x1e6   : > { %s863_s3 = scalar_lea.hbm %s1102_s26, 64  ;;  %s867_s23 = scalar_lea.hbm %s1163_s8, 256 }
 0x1e7   : > { %p864_p9 = scmp.ne.s32.totalorder %s1102_s26, %s863_s3  ;;  %p868_p12 = scmp.lt.u32.totalorder %s1102_s26, %s1163_s8 }
 0x1e8   : > { %p869_p13 = scmp.lt.u32.totalorder %s867_s23, %s863_s3  ;;  %p871_p1 = scmp.lt.u32.totalorder %s863_s3, %s1102_s26 }
 0x1e9   : > { %p865_p10 = pnand %p864_p9, %p1045_p3 }
 0x1ea   : > { %p870_p0 = por %p869_p13, %p868_p12 }
 0x1eb   : > { %p866_p11 = pneg %p865_p10 }
 0x1ec   : > { %p872_p2 = por %p871_p1, %p870_p0 }
 0x1ee   : > { %p873_p4 = pnand %p872_p2, %p866_p11 }
 0x1f0   : > { %876 = shalt.err (!%p873_p4)
}
 0x1f1   : > { %771 = dma.vmem_to_hbm [thread:$0]  (%p1045_p3), %s1104_s22, 64, %s1102_s26, %s619_s9  }
 0x1f2 PF: > { %p777_p5 = scmp.ge.s32.totalorder %s943_s12, 2  ;;  %s646_s20 = sand.u32 1, %s915_s27  }
 0x1f3   : > { %s647_s21 = scalar_lea.sflag [#allocation3], %s646_s20 }
 0x1f4   : > { %p774_p6 = pnand %p777_p5, %p1054_p8 }
 0x1f6   : > { %910 = dma.done.wait (!%p774_p6), %s647_s21, 64  }
 0x1f7   : > { %912 = vsyncadd (!%p774_p6), %s647_s21, 4294967232  ;;  %s21_s12 = sadd.s32 1, %s943_s12   ;;  %s1177_s18 = sld [smem:[#allocation9_spill]] }
 0x1f8   : > { %p18_p7 = scmp.ge.s32.totalorder %s21_s12, 6   ;;  %s1178_s30 = sld [smem:[#allocation5_spill]] }
 0x1f9   : > { %s1179_s9 = sld [smem:[#allocation6_spill]]  ;;  %s1180_s10 = sld [smem:[#allocation7_spill]] }
 0x1fa   : > { %s1181_s11 = sld [smem:[#allocation8_spill]]  ;;  %s1182_s27 = smov %s919_s28 }
 0x1fb   : > { %s1183_s28 = smov %s923_s29  ;;  %20 = sbr.rel (!%p18_p7) target bundleno = 7 (0x7), region = 90 }
 0x1fd   : > { %s1184_s29 = smov %s1177_s18 }
 0x202   :  { %652 = vsyncpa [#allocation3], 1 }
 0x203   :  { %654 = vsyncpa [#allocation3 + $0x1], 1 }

// kernel: tpu_custom_call.1
= control target key start
LH: loop header
LB: loop body
LE: loop exit
PB: predicated region body
PF: predicated region fallthrough
CT: control target
= control target key end

     0   :  { %s1155_s0 = inlined_call_operand.vmem [shape: f32[2,4,256], index: 0, kind: input, shape index: {}]   ;;  %s1156_s1 = inlined_call_operand.vmem [shape: f32[2,4,256], index: 1, kind: input, shape index: {}]   ;;  %s1157_s2 = inlined_call_operand.vmem [shape: f32[8,4], index: 2, kind: input, shape index: {}]   ;;  %s1158_s3 = inlined_call_operand.vmem [shape: f32[8,1], index: 3, kind: input, shape index: {}]   ;;  %s1159_s4 = inlined_call_operand.vmem [shape: f32[8,4], index: 4, kind: input, shape index: {}]   ;;  %s1160_s5 = inlined_call_operand.vmem [shape: f32[8,1], index: 5, kind: input, shape index: {}]   ;;  %s1161_s6 = inlined_call_operand.vmem [shape: f32[4,8], index: 6, kind: input, shape index: {}]   ;;  %s1162_s7 = inlined_call_operand.vmem [shape: f32[4,1], index: 7, kind: input, shape index: {}]   ;;  %s1163_s8 = inlined_call_operand.hbm [shape: f32[2,4,256], index: 8, kind: output, shape index: {}]  }
   0x1   :  { %1168 = sst [smem:[#allocation10_spill]] %s1158_s3 }
   0x2   :  { %13 = vsyncpa [#allocation3], 0 }
   0x3   :  { %15 = vsyncpa [#allocation3 + $0x1], 0  ;;  %s994_s27 = smov 0   ;;  %s996_s28 = smov 0  }
   0x4   :  { %s998_s29 = smov 0   ;;  %s1000_s30 = smov 0  }
   0x5   :  { %s1002_s9 = smov 0   ;;  %s1004_s10 = smov 0  }
   0x6   :  { %s1006_s11 = smov 0   ;;  %s1008_s12 = smov 0  }
   0x7 LB: > { %1169 = sst [smem:[#allocation5_spill]] %s935_s10  ;;  %s730_s13 = sadd.s32 4294967295, %s943_s12   ;;  %s943_s12 = sphi %s1008_s12, %s21_s12   ;;  %s939_s11 = sphi %s1006_s11, %s1181_s11   ;;  %s935_s10 = sphi %s1004_s10, %s1180_s10   ;;  %s931_s9 = sphi %s1002_s9, %s1179_s9   ;;  %s927_s30 = sphi %s1000_s30, %s1178_s30   ;;  %s923_s29 = sphi %s998_s29, %s1184_s29   ;;  %s919_s28 = sphi %s996_s28, %s1183_s28   ;;  %s915_s27 = sphi %s994_s27, %s1182_s27  }
   0x8   : > { %1170 = sst [smem:[#allocation6_spill]] %s939_s11  ;;  %s731_s14 = sadd.s32 4294967294, %s943_s12  }
   0x9   : > { %s30_s15 = sadd.s32 1, %s935_s10  ;;  %s33_s16 = sadd.s32 1, %s939_s11 }
   0xa   : > { %p31_p0 = scmp.ge.s32.totalorder %s30_s15, 2  ;;  %p234_p1 = scmp.ne.s32.totalorder %s923_s29, %s919_s28 }
   0xb   : > { %p235_p2 = scmp.eq.s32.totalorder %s730_s13, 3  ;;  %p240_p5 = scmp.ne.s32.totalorder %s919_s28, %s915_s27 }
   0xc   : > { %s1186_s15 = smov (%p31_p0, %s30_s15), 0  ;;  %s1188_s16 = smov (!%p31_p0, %s33_s16), %s939_s11 }
   0xd   : > { %1171 = sst [smem:[#allocation7_spill]] %s1186_s15  ;;  %s220_s17 = ssub.s32 %s935_s10, %s1186_s15 }
   0xe   : > { %p1045_p3 = por %p235_p2, %p234_p1  ;;  %p35_p4 = scmp.ge.s32.totalorder %s1188_s16, 2 }
   0xf   : > { %p241_p6 = scmp.eq.s32.totalorder %s731_s14, 3  ;;  %p734_p7 = scmp.ge.s32.totalorder %s943_s12, 1 }
  0x10   : > { %s1190_s16 = smov (%p35_p4, %s1188_s16), 0  ;;  %p299_p9 = scmp.lt.s32.totalorder %s943_s12, 5 }
  0x11   : > { %1173 = sst [smem:[#allocation8_spill]] %s1190_s16  ;;  %p1054_p8 = por %p241_p6, %p240_p5 }
  0x12   : > { %s219_s20 = ssub.s32 %s939_s11, %s1190_s16  ;;  %s224_s21 = sadd.s32 1, %s923_s29 }
  0x13   : > { %s221_s22 = sor.u32 %s220_s17, %s219_s20  ;;  %p300_p10 = pnand %p734_p7, %p299_p9 }
  0x14   : > { %p222_p11 = scmp.eq.s32.totalorder %s221_s22, 0  ;;  %p344_p12 = scmp.lt.s32.totalorder (!%p300_p10), %s931_s9, 1  ;;  %v945_v0 = vmov (!%p300_p10), 0.0   ;;  %vm946_vm0 = vmmov (!%p300_p10), 0   ;;  %v947_v2 = vmov (!%p300_p10), 0   ;;  %v448_v3 = vld [vmem:[%s1160_s5] sm:$0xff] (!%p300_p10) }
  0x15   : > { %303 = sbr.rel (%p300_p10) target bundleno = 498 (0x1f2), region = 52  ;;  %p346_p13 = scmp.lt.s32.totalorder (!%p300_p10), %s927_s30, 1  ;;  %756 = vmatprep.subr.mxu0 (!%p300_p10), %v945_v0  ;;  %761 = vmatprep.subr.mxu1 (!%p300_p10), %v945_v0  ;;  %vm373_vm1 = vcmask (!%p300_p10), 1043456   ;;  %v362_v4 = vld [vmem:[%s1157_s2] sm:$0xff] (!%p300_p10)  ;;  %vm369_vm2 = vcmask (!%p300_p10), 31744   ;;  %vm543_vm3 = vcmask (!%p300_p10), 64512  }
  0x16   : > { %s1063_s23 = scalar_select %p222_p11, %s923_s29, %s224_s21  }
  0x17   : > { %s1176_s3 = sld [smem:[#allocation10_spill]] (!%p300_p10)  ;;  %758 = vmatprep.mubr.msk.f32.mxu0 (!%p300_p10), %vm946_vm0, %v945_v0  ;;  %763 = vmatprep.mubr.msk.f32.mxu1 (!%p300_p10), %vm946_vm0, %v945_v0  ;;  %v447_v5 = vld [vmem:[%s1159_s4] sm:$0xff] (!%p300_p10) }
  0x18   : > { %1175 = sst [smem:[#allocation9_spill]] %s1063_s23  ;;  %845 = vset.pattern.permute.xlu0 (!%p300_p10), %v947_v2  ;;  %846 = vset.pattern.permute.xlu1 (!%p300_p10), %v947_v2  ;;  %v537_v8 = vld [vmem:[%s1162_s7] sm:$0xf] (!%p300_p10) }
  0x19   : > { %540 = vperm.xlu1 (!%p300_p10), %846, %v537_v8   ;;  %v536_v23 = vld [vmem:[%s1161_s6] sm:$0xf] (!%p300_p10) }
  0x1c   : > { %s345_s26 = scalar_select %p344_p12, %s931_s9, 1 }
  0x1d   : > { %v363_v1 = vld [vmem:[%s1176_s3] sm:$0xff]  ;;  %s347_s13 = scalar_select %p346_p13, %s927_s30, 1 }
  0x1e   : > { %s736_s14 = sshll.u32 %s345_s26, 1  ;;  %366 = vperm.xlu0 %845, %v363_v1  }
  0x1f   : > { %s349_s17 = sadd.s32 %s736_s14, %s347_s13  ;;  %s746_s14 = sshll.u32 %s931_s9, 1 }
  0x20   : > { %s737_s22 = sshll.u32 %s349_s17, 2  ;;  %s630_s17 = sadd.s32 %s927_s30, %s746_s14 }
  0x21   : > { %s351_s3 = scalar_lea.vmem %s1155_s0, %s737_s22  ;;  %s359_s11 = scalar_lea.vmem %s1156_s1, %s737_s22 }
  0x22   : > { %v360_v6 = vld [vmem:[%s351_s3] sm:$0xf]  ;;  %451 = vperm.xlu0 %845, %v448_v3   ;;  %s747_s20 = sshll.u32 %s630_s17, 6  ;;  %s948_s13 = smov [#allocation2]  }
  0x23   : > { %v361_v7 = vld [vmem:[%s359_s11] sm:$0xf]  ;;  %757 = vmatpush3.msk.msra.mxu0 %vm373_vm1, %v360_v6  ;;  %s341_s11 = sand.u32 1, %s919_s28   ;;  %s1102_s26 = scalar_lea.hbm %s1163_s8, %s747_s20 }
  0x24   : > { %762 = vmatpush3.msk.msra.mxu1 %vm373_vm1, %v361_v7  ;;  %759 = vmatmul.mubr.msk.f32.vlgmr.msra.gmra.mrb[0].mxu0 %vm369_vm2, %v362_v4  ;;  %s735_s23 = sshll.u32 %s341_s11, 2  ;;  %s619_s9 = scalar_lea.sflag [#allocation3], %s341_s11 }
  0x25   : > { %764 = vmatmul.mubr.msk.f32.vlgmr.msra.gmra.mrb[0].mxu1 %vm369_vm2, %v447_v5  ;;  %766 = vmatprep.subr.mxu0 %v945_v0  ;;  %s343_s21 = scalar_lea.vmem [#allocation2], %s735_s23  ;;  %s853_s15 = sshll.u32 %s948_s13, 4  ;;  %s854_s15 = int_to_ptr.vmem [resolvable:$false] %s853_s15 }
  0x26   : > { %768 = vmatprep.mubr.msk.f32.mxu0 %vm946_vm0, %v945_v0  ;;  %s634_s22 = sshll.u32 %s343_s21, 4  ;;  %s855_s16 = scalar_lea.vmem %s854_s15, 128  ;;  %s1104_s22 = int_to_ptr.vmem [resolvable:$true] %s634_s22 }
  0x27   : > { %s849_s30 = scalar_lea.vmem %s1104_s22, 64  ;;  %p856_p4 = scmp.lt.s32.totalorder %s1104_s22, %s854_s15 }
  0x28   : > { %p850_p0 = scmp.ne.s32.totalorder %s1104_s22, %s849_s30  ;;  %p857_p5 = scmp.lt.s32.totalorder %s855_s16, %s849_s30 }
  0x2a   : > { %p851_p1 = pnand %p850_p0, %p1045_p3  ;;  %p858_p6 = por %p857_p5, %p856_p4 }
  0x2c   : > { %p852_p2 = pneg %p851_p1 }
  0x2e   : > { %p859_p7 = pnand %p858_p6, %p852_p2 }
  0x98   : > { %v541_v24 = vpop.permute.xlu1 %540 }
  0x9d   : > { %v367_v9 = vpop.permute.xlu0 %366 }
  0xa1   : > { %v452_v17 = vpop.permute.xlu0 %451 }
  0xf7   : > { %v443_v10 = vpop.f32.mrb[0].mxu0 }
  0xf8   : > { %v526_v11 = vpop.f32.mrb[0].mxu1  ;;  %v444_v12 = vadd.f32 %v443_v10, %v367_v9  ;;  %v760_v13 = vpop.f32.mrb[1].mxu0 }
  0xf9   : > { %v765_v14 = vpop.f32.mrb[1].mxu1  ;;  %v527_v20 = vadd.f32 %v526_v11, %v452_v17 }
  0xfa   : > { %v531_v15 = vmul.f32 0.70710677, %v444_v12  ;;  %v530_v18 = vmul.f32 0.5, %v444_v12 }
  0xfc   : > { %847 = verf.f32 %v531_v15 }
 0x106   : > { %v848_v16 = vpop.eup %847 }
 0x107   : > { %v533_v19 = vadd.f32 1.0, %v848_v16 }
 0x109   : > { %v534_v21 = vmul.f32 %v533_v19, %v530_v18 }
 0x10b   : > { %v535_v22 = vmul.f32 %v534_v21, %v527_v20 }
 0x10d   : > { %767 = vmatpush3.msra.mxu0 %v535_v22 }
 0x10e   : > { %769 = vmatmul.mubr.msk.f32.vlgmr.msra.gmra.mrb[2].mxu0 %vm543_vm3, %v536_v23 }
 0x1e1   : > { %v613_v25 = vpop.f32.mrb[2].mxu0 }
 0x1e2   : > { %v614_v26 = vadd.f32 %v613_v25, %v541_v24  ;;  %v770_v27 = vpop.f32.mrb[3].mxu0 }
 0x1e4   : > { %617 = vst [vmem:[%s343_s21] sm:$0xf] %v614_v26 }
 0x1e5   : > { %862 = shalt.err (!%p859_p7)
}
 0x1e6   : > { %s863_s3 = scalar_lea.hbm %s1102_s26, 64  ;;  %s867_s23 = scalar_lea.hbm %s1163_s8, 256 }
 0x1e7   : > { %p864_p9 = scmp.ne.s32.totalorder %s1102_s26, %s863_s3  ;;  %p868_p12 = scmp.lt.u32.totalorder %s1102_s26, %s1163_s8 }
 0x1e8   : > { %p869_p13 = scmp.lt.u32.totalorder %s867_s23, %s863_s3  ;;  %p871_p1 = scmp.lt.u32.totalorder %s863_s3, %s1102_s26 }
 0x1e9   : > { %p865_p10 = pnand %p864_p9, %p1045_p3 }
 0x1ea   : > { %p870_p0 = por %p869_p13, %p868_p12 }
 0x1eb   : > { %p866_p11 = pneg %p865_p10 }
 0x1ec   : > { %p872_p2 = por %p871_p1, %p870_p0 }
 0x1ee   : > { %p873_p4 = pnand %p872_p2, %p866_p11 }
 0x1f0   : > { %876 = shalt.err (!%p873_p4)
}
 0x1f1   : > { %771 = dma.vmem_to_hbm [thread:$0]  (%p1045_p3), %s1104_s22, 64, %s1102_s26, %s619_s9  }
 0x1f2 PF: > { %p777_p5 = scmp.ge.s32.totalorder %s943_s12, 2  ;;  %s646_s20 = sand.u32 1, %s915_s27  }
 0x1f3   : > { %s647_s21 = scalar_lea.sflag [#allocation3], %s646_s20 }
 0x1f4   : > { %p774_p6 = pnand %p777_p5, %p1054_p8 }
 0x1f6   : > { %910 = dma.done.wait (!%p774_p6), %s647_s21, 64  }
 0x1f7   : > { %912 = vsyncadd (!%p774_p6), %s647_s21, 4294967232  ;;  %s21_s12 = sadd.s32 1, %s943_s12   ;;  %s1177_s18 = sld [smem:[#allocation9_spill]] }
 0x1f8   : > { %p18_p7 = scmp.ge.s32.totalorder %s21_s12, 6   ;;  %s1178_s30 = sld [smem:[#allocation5_spill]] }
 0x1f9   : > { %s1179_s9 = sld [smem:[#allocation6_spill]]  ;;  %s1180_s10 = sld [smem:[#allocation7_spill]] }
 0x1fa   : > { %s1181_s11 = sld [smem:[#allocation8_spill]]  ;;  %s1182_s27 = smov %s919_s28 }
 0x1fb   : > { %s1183_s28 = smov %s923_s29  ;;  %20 = sbr.rel (!%p18_p7) target bundleno = 7 (0x7), region = 90 }
 0x1fd   : > { %s1184_s29 = smov %s1177_s18 }
 0x202   :  { %652 = vsyncpa [#allocation3], 1 }
 0x203   :  { %654 = vsyncpa [#allocation3 + $0x1], 1 }

</bundles_post_ra>
